<compile_context>
chip_gen: v5e
topology: v5e:2x2
jax: 0.10.0
libtpu: 0.0.40
codegen_flags: <defaults>
</compile_context>

<pallas_src>
import jax
import jax.numpy as jnp
from jax.experimental import pallas as pl
from jax.experimental.pallas import tpu as pltpu


# ----------------------------------------------------------------------------
# VGG19 "features" architecture, modules 0..26 (27..36 never feed an output).
# ----------------------------------------------------------------------------
_CONV_CFGS = [
    (3, 64), (64, 64),                                  # block 1
    (64, 128), (128, 128),                              # block 2
    (128, 256), (256, 256), (256, 256), (256, 256),     # block 3
    (256, 512), (512, 512), (512, 512), (512, 512),     # block 4
]
_BLOCK_SIZES = (2, 2, 4, 4)
OUTPUT_LAYER_LIST = [0, 1, 2, 3, 5, 6, 7, 8, 10, 11, 12, 13, 14, 15, 16, 17,
                     19, 20, 21, 22, 23, 24, 25, 26]


# ----------------------------------------------------------------------------
# TPU-generation aware VMEM budgeting
# ----------------------------------------------------------------------------
def _vmem_limit_bytes():
    phys = 64 * 1024 * 1024            # v7x physical VMEM; safe everywhere
    try:
        info = pltpu.get_tpu_info()
        phys = int(getattr(info, "vmem_capacity_bytes", phys))
    except Exception:
        pass
    return min(int(phys * 0.70), 100 * 1024 * 1024)


def _divisors_desc(n):
    return [d for d in range(n, 0, -1) if n % d == 0]


def _pick_conv_tiles(H, W, Cin, Cout, budget):
    """Largest row tile first (fewest weight re-fetches), then largest Cout tile."""
    tco_opts = [c for c in (512, 256, 128) if c <= Cout and Cout % c == 0]
    if not tco_opts:
        tco_opts = [Cout]
    for th in _divisors_desc(H):
        for tco in tco_opts:
            x_b = (th + 2) * (W + 2) * Cin * 4            # halo scratch (f32)
            w_b = 2 * 9 * Cin * tco * 2                   # bf16 weights, 2 bufs
            o_b = 2 * 2 * th * W * tco * 4                # conv + relu, 2 bufs
            a_b = th * W * tco * 4                        # f32 accumulator
            if x_b + w_b + o_b + a_b <= budget:
                return th, tco
    return 1, tco_opts[-1]


# ----------------------------------------------------------------------------
# Pallas kernels
# ----------------------------------------------------------------------------
def _conv1_kernel(p_ref, w_ref, b_ref, conv_ref, relu_ref):
    # p_ref: (1, th, W, K=32) im2col patches (f32); w_ref: (K, Cout) bf16
    th, W, Cout = conv_ref.shape[1], conv_ref.shape[2], conv_ref.shape[3]
    K = p_ref.shape[3]
    xs = p_ref[0].reshape(th * W, K).astype(jnp.bfloat16)
    acc = jnp.dot(xs, w_ref[...], preferred_element_type=jnp.float32)
    acc = acc + b_ref[...]
    conv_ref[...] = acc.reshape(1, th, W, Cout)
    relu_ref[...] = jnp.maximum(acc, 0.0).reshape(1, th, W, Cout)


def _conv3x3_kernel(xp_hbm, w_ref, b_ref, conv_ref, relu_ref, x_vmem, load_sem):
    # xp_hbm: (N, H+2, W+2, Cin) zero-padded activations left in HBM (pl.ANY)
    # w_ref : (3, 3, Cin, tco) bf16;  b_ref: (1, tco) f32
    # conv_ref / relu_ref: (1, th, W, tco) f32
    # x_vmem: (1, th+2, W+2, Cin) f32 scratch holding the current halo'd row tile
    n = pl.program_id(0)
    r = pl.program_id(1)
    co = pl.program_id(2)
    th, W, tco = conv_ref.shape[1], conv_ref.shape[2], conv_ref.shape[3]
    Cin = x_vmem.shape[3]

    # Fetch the (th + 2)-row halo window once per (n, r); it stays resident in
    # scratch while we sweep the Cout tiles (innermost "arbitrary" grid axis).
    @pl.when(co == 0)
    def _load_rows():
        cp = pltpu.make_async_copy(
            xp_hbm.at[pl.ds(n, 1), pl.ds(r * th, th + 2)], x_vmem, load_sem)
        cp.start()
        cp.wait()

    acc = jnp.zeros((th * W, tco), jnp.float32)
    # 3x3 conv (stride 1, pad 1) as 9 shifted (th*W, Cin) @ (Cin, tco) matmuls,
    # bf16 MXU inputs with f32 accumulation.
    for dy in range(3):
        for dx in range(3):
            xs = x_vmem[0, dy:dy + th, dx:dx + W, :]
            xs = xs.reshape(th * W, Cin).astype(jnp.bfloat16)
            acc = acc + jnp.dot(xs, w_ref[dy, dx],
                                preferred_element_type=jnp.float32)
    acc = acc + b_ref[...]
    conv_ref[...] = acc.reshape(1, th, W, tco)
    relu_ref[...] = jnp.maximum(acc, 0.0).reshape(1, th, W, tco)


def _maxpool_kernel(x_ref, o_ref):
    # x_ref: (1, 2*tp, Wo, 2*C) -- the W pairs were folded into the lane axis
    # by a free HBM reshape in the wrapper; o_ref: (1, tp, Wo, C).
    tp, Wo, C = o_ref.shape[1], o_ref.shape[2], o_ref.shape[3]
    x = x_ref[0]
    m = jnp.maximum(x[:, :, :C], x[:, :, C:])           # max over W pairs
    m = m.reshape(tp, 2, Wo, C)
    o_ref[...] = jnp.maximum(m[:, 0], m[:, 1]).reshape(1, tp, Wo, C)


# ----------------------------------------------------------------------------
# Wrappers
# ----------------------------------------------------------------------------
def conv1_norm_im2col_relu(x, w, b, mean, std, vmem_limit):
    """conv1_1 with the input normalization folded in.

    (x - mean) is done here on the tiny 3-channel tensor; 1/std is folded into
    the weights, so the zero spatial padding behaves exactly like PyTorch's
    zero padding of the normalized input.  The 27 taps are im2col'ed to K=32 so
    conv1_1 is one MXU matmul instead of nine K=3 matmuls.
    Returns (conv_out, relu_out), both NHWC f32.
    """
    N, H, W, _ = x.shape
    Cout = w.shape[-1]
    K = 32

    w_f = w.astype(jnp.float32) / std.reshape(1, 1, 3, 1)
    wmat = jnp.pad(w_f.reshape(27, Cout), ((0, K - 27), (0, 0)))
    wmat = wmat.astype(jnp.bfloat16)
    b2 = b.reshape(1, Cout).astype(jnp.float32)

    xc = x - mean.reshape(1, 1, 1, 3)
    xp = jnp.pad(xc, ((0, 0), (1, 1), (1, 1), (0, 0)))
    cols = [xp[:, dy:dy + H, dx:dx + W, :] for dy in range(3) for dx in range(3)]
    patches = jnp.concatenate(cols, axis=-1)             # (N, H, W, 27)
    patches = jnp.pad(patches, ((0, 0), (0, 0), (0, 0), (0, K - 27)))

    budget = int(vmem_limit * 0.6)
    th = 1
    for d in _divisors_desc(H):
        tot = 2 * d * W * K * 4 + 2 * 2 * d * W * Cout * 4 + d * W * Cout * 4
        if tot <= budget:
            th = d
            break

    return pl.pallas_call(
        _conv1_kernel,
        out_shape=(jax.ShapeDtypeStruct((N, H, W, Cout), jnp.float32),
                   jax.ShapeDtypeStruct((N, H, W, Cout), jnp.float32)),
        grid=(N, H // th),
        in_specs=[
            pl.BlockSpec((1, th, W, K), lambda n, r: (n, r, 0, 0)),
            pl.BlockSpec((K, Cout), lambda n, r: (0, 0)),
            pl.BlockSpec((1, Cout), lambda n, r: (0, 0)),
        ],
        out_specs=[
            pl.BlockSpec((1, th, W, Cout), lambda n, r: (n, r, 0, 0)),
            pl.BlockSpec((1, th, W, Cout), lambda n, r: (n, r, 0, 0)),
        ],
        compiler_params=pltpu.CompilerParams(
            dimension_semantics=("parallel", "parallel"),
            vmem_limit_bytes=vmem_limit),
    )(patches, wmat, b2)


def conv3x3_relu(x, w_bf16, b, vmem_limit):
    """Fused 3x3 conv (pad=1, stride=1) + ReLU.  Returns (conv_out, relu_out)."""
    N, H, W, Cin = x.shape
    Cout = w_bf16.shape[-1]
    th, tco = _pick_conv_tiles(H, W, Cin, Cout, int(vmem_limit * 0.6))

    xp = jnp.pad(x, ((0, 0), (1, 1), (1, 1), (0, 0)))
    b2 = b.reshape(1, Cout).astype(jnp.float32)

    return pl.pallas_call(
        _conv3x3_kernel,
        out_shape=(jax.ShapeDtypeStruct((N, H, W, Cout), jnp.float32),
                   jax.ShapeDtypeStruct((N, H, W, Cout), jnp.float32)),
        grid=(N, H // th, Cout // tco),
        in_specs=[
            pl.BlockSpec(memory_space=pl.ANY),            # padded activations (HBM)
            pl.BlockSpec((3, 3, Cin, tco), lambda n, r, co: (0, 0, 0, co)),
            pl.BlockSpec((1, tco), lambda n, r, co: (0, co)),
        ],
        out_specs=[
            pl.BlockSpec((1, th, W, tco), lambda n, r, co: (n, r, 0, co)),
            pl.BlockSpec((1, th, W, tco), lambda n, r, co: (n, r, 0, co)),
        ],
        scratch_shapes=[
            pltpu.VMEM((1, th + 2, W + 2, Cin), jnp.float32),
            pltpu.SemaphoreType.DMA(()),
        ],
        compiler_params=pltpu.CompilerParams(
            dimension_semantics=("parallel", "parallel", "arbitrary"),
            vmem_limit_bytes=vmem_limit),
    )(xp, w_bf16, b2)


def maxpool2x2(x, vmem_limit):
    """2x2 max pool, stride 2 (odd trailing rows/cols dropped, as in MaxPool2d(2,2))."""
    N, H, W, C = x.shape
    Ho, Wo = H // 2, W // 2
    x = x[:, :2 * Ho, :2 * Wo, :]
    xr = x.reshape(N, 2 * Ho, Wo, 2 * C)   # free reshape: W pairs -> lane axis

    budget = int(vmem_limit * 0.6)
    tp = 1
    for d in _divisors_desc(Ho):
        if 2 * (2 * d) * Wo * 2 * C * 4 + 2 * d * Wo * C * 4 <= budget:
            tp = d
            break

    return pl.pallas_call(
        _maxpool_kernel,
        out_shape=jax.ShapeDtypeStruct((N, Ho, Wo, C), jnp.float32),
        grid=(N, Ho // tp),
        in_specs=[pl.BlockSpec((1, 2 * tp, Wo, 2 * C), lambda n, r: (n, r, 0, 0))],
        out_specs=pl.BlockSpec((1, tp, Wo, C), lambda n, r: (n, r, 0, 0)),
        compiler_params=pltpu.CompilerParams(
            dimension_semantics=("parallel", "parallel"),
            vmem_limit_bytes=vmem_limit),
    )(xr)


# ----------------------------------------------------------------------------
# Full forward pass (semantics of VGG19_Extractor.forward)
# ----------------------------------------------------------------------------
def vgg19_extractor(x_nchw, params, mean, std, *, nchw_outputs=True):
    """x_nchw: (N, 3, H, W) float32, like the PyTorch module.

    Returns the 24 feature maps of output_layer_list, in order, NCHW.
    Set nchw_outputs=False to skip the 24 final transposes if the consumer
    accepts NHWC (saves 24 full feature-map HBM passes).
    """
    vmem_limit = _vmem_limit_bytes()
    x = jnp.transpose(x_nchw, (0, 2, 3, 1)).astype(jnp.float32)   # -> NHWC

    outputs = []
    conv_i = 0
    for blk, n_convs in enumerate(_BLOCK_SIZES):
        for _ in range(n_convs):
            w, b = params[conv_i]
            if conv_i == 0:
                conv_out, relu_out = conv1_norm_im2col_relu(
                    x, w, b, mean, std, vmem_limit)
            else:
                conv_out, relu_out = conv3x3_relu(
                    x, w.astype(jnp.bfloat16), b, vmem_limit)
            outputs.append(conv_out)       # module 0, 2, 5, 7, ...
            outputs.append(relu_out)       # module 1, 3, 6, 8, ...
            x = relu_out
            conv_i += 1
        if blk < 3:                        # pools (modules 4, 9, 18); 27 unused
            x = maxpool2x2(x, vmem_limit)

    if nchw_outputs:
        outputs = [jnp.transpose(o, (0, 3, 1, 2)) for o in outputs]
    return outputs


def init_params(key):
    """Deterministic synthetic weights with VGG19 conv shapes (HWIO)."""
    params = []
    for cin, cout in _CONV_CFGS:
        key, kw, kb = jax.random.split(key, 3)
        scale = (2.0 / (cin * 9)) ** 0.5
        w = scale * jax.random.normal(kw, (3, 3, cin, cout), jnp.float32)
        b = 0.01 * jax.random.normal(kb, (cout,), jnp.float32)
        params.append((w, b))
    return params


def _conv1_reference(x_nchw, w, b, mean, std):
    """Pure-JAX f32 reference for module 0 (normalize + conv1_1)."""
    x = jnp.transpose(x_nchw, (0, 2, 3, 1)).astype(jnp.float32)
    xn = (x - mean.reshape(1, 1, 1, 3)) / std.reshape(1, 1, 1, 3)
    y = jax.lax.conv_general_dilated(
        xn, w, window_strides=(1, 1), padding=((1, 1), (1, 1)),
        dimension_numbers=("NHWC", "HWIO", "NHWC"),
        precision=jax.lax.Precision.HIGHEST)
    return jnp.transpose(y + b.reshape(1, 1, 1, -1), (0, 3, 1, 2))


if __name__ == "__main__":
    key = jax.random.PRNGKey(0)
    kx, kp, kt = jax.random.split(key, 3)

    # Small NCHW input consistent with the module (3 input channels required).
    x = jax.random.uniform(kx, (2, 3, 16, 16), jnp.float32)
    params = init_params(kp)
    mean = jnp.array([0.485, 0.456, 0.406], jnp.float32)
    std = jnp.array([0.229, 0.224, 0.225], jnp.float32)

    outs = vgg19_extractor(x, params, mean, std)
    outs = jax.block_until_ready(outs)

    assert len(outs) == len(OUTPUT_LAYER_LIST) == 24
    assert outs[0].shape == (2, 64, 16, 16)     # module 0  (conv1_1)
    assert outs[4].shape == (2, 128, 8, 8)      # module 5  (conv2_1)
    assert outs[8].shape == (2, 256, 4, 4)      # module 10 (conv3_1)
    assert outs[-1].shape == (2, 512, 2, 2)     # module 26 (relu4_4)
    assert all(bool(jnp.isfinite(o).all()) for o in outs)

    # Fused ReLU output must be exactly max(conv_out, 0).
    assert bool(jnp.array_equal(outs[1], jnp.maximum(outs[0], 0.0)))

    # Folded-normalization conv1_1 vs. pure f32 JAX reference (bf16 MXU inputs
    # with f32 accumulation -> small relative error).
    ref0 = _conv1_reference(x, params[0][0], params[0][1], mean, std)
    rel = float(jnp.linalg.norm(outs[0] - ref0) / (jnp.linalg.norm(ref0) + 1e-6))
    assert rel < 3e-2, f"conv1_1 relative error too large: {rel}"

    # The pooling kernel is exact: compare against a plain-JAX max reduce.
    xt = jax.random.normal(kt, (2, 16, 16, 64), jnp.float32)
    p_ref = jnp.max(xt.reshape(2, 8, 2, 8, 2, 64), axis=(2, 4))
    p_out = jax.block_until_ready(maxpool2x2(xt, _vmem_limit_bytes()))
    assert bool(jnp.array_equal(p_out, p_ref))

    print("KERNEL_OK")
</pallas_src>

<mosaic_0001>
module attributes {stable_mosaic.version = 11 : i64} {
  func.func @_conv1_kernel(%arg0: i32, %arg1: i32, %arg2: memref<1x16x16x32xf32, #tpu.memory_space<vmem>>, %arg3: memref<32x64xbf16, #tpu.memory_space<vmem>>, %arg4: memref<1x64xf32, #tpu.memory_space<vmem>>, %arg5: memref<1x16x16x64xf32, #tpu.memory_space<vmem>>, %arg6: memref<1x16x16x64xf32, #tpu.memory_space<vmem>>) attributes {dimension_semantics = [#tpu.dimension_semantics<parallel>, #tpu.dimension_semantics<parallel>], iteration_bounds = array<i64: 2, 1>, scalar_prefetch = 0 : i64, scratch_operands = 0 : i64, tpu.core_type = #tpu.core_type<tc>, window_params = [{transform_indices = @transform_0, window_bounds = array<i64: 1, 16, 16, 32>}, {pipeline_mode = #tpu.pipeline_mode<synchronous>, transform_indices = @transform_1, window_bounds = array<i64: 32, 64>}, {pipeline_mode = #tpu.pipeline_mode<synchronous>, transform_indices = @transform_2, window_bounds = array<i64: 1, 64>}, {transform_indices = @transform_3, window_bounds = array<i64: 1, 16, 16, 64>}, {transform_indices = @transform_4, window_bounds = array<i64: 1, 16, 16, 64>}]} {
    %c0 = arith.constant 0 : index
    %c0_0 = arith.constant 0 : index
    %c0_1 = arith.constant 0 : index
    %c0_2 = arith.constant 0 : index
    %0 = vector.load %arg2[%c0, %c0_0, %c0_1, %c0_2] : memref<1x16x16x32xf32, #tpu.memory_space<vmem>>, vector<1x16x16x32xf32>
    %1 = vector.shape_cast %0 : vector<1x16x16x32xf32> to vector<16x16x32xf32>
    %2 = vector.shape_cast %1 : vector<16x16x32xf32> to vector<256x32xf32>
    %3 = arith.truncf %2 : vector<256x32xf32> to vector<256x32xbf16>
    %c0_3 = arith.constant 0 : index
    %c0_4 = arith.constant 0 : index
    %4 = vector.load %arg3[%c0_3, %c0_4] : memref<32x64xbf16, #tpu.memory_space<vmem>>, vector<32x64xbf16>
    %cst = arith.constant dense<0.000000e+00> : vector<256x64xf32>
    %5 = tpu.matmul %3, %4, %cst {dimension_numbers = #tpu.dot_dimension_numbers<[1], [0], [0], [1], [0, 0, 1, 1], [], []>} : vector<256x32xbf16>, vector<32x64xbf16>, vector<256x64xf32> -> vector<256x64xf32>
    %c0_5 = arith.constant 0 : index
    %c0_6 = arith.constant 0 : index
    %6 = vector.load %arg4[%c0_5, %c0_6] : memref<1x64xf32, #tpu.memory_space<vmem>>, vector<1x64xf32>
    %7 = vector.broadcast %6 : vector<1x64xf32> to vector<256x64xf32>
    %8 = arith.addf %5, %7 : vector<256x64xf32>
    %9 = vector.shape_cast %8 : vector<256x64xf32> to vector<1x16x16x64xf32>
    %c0_7 = arith.constant 0 : index
    %c0_8 = arith.constant 0 : index
    %c0_9 = arith.constant 0 : index
    %c0_10 = arith.constant 0 : index
    %10 = vector.load %arg5[%c0_7, %c0_8, %c0_9, %c0_10] : memref<1x16x16x64xf32, #tpu.memory_space<vmem>>, vector<1x16x16x64xf32>
    tpu.vector_store %arg5[%c0_7, %c0_8, %c0_9, %c0_10], %9 {strides = array<i32>} : memref<1x16x16x64xf32, #tpu.memory_space<vmem>>, vector<1x16x16x64xf32>,
    %cst_11 = arith.constant 0.000000e+00 : f32
    %11 = vector.broadcast %cst_11 : f32 to vector<256x64xf32>
    %12 = arith.maximumf %8, %11 : vector<256x64xf32>
    %13 = vector.shape_cast %12 : vector<256x64xf32> to vector<1x16x16x64xf32>
    %c0_12 = arith.constant 0 : index
    %c0_13 = arith.constant 0 : index
    %c0_14 = arith.constant 0 : index
    %c0_15 = arith.constant 0 : index
    %14 = vector.load %arg6[%c0_12, %c0_13, %c0_14, %c0_15] : memref<1x16x16x64xf32, #tpu.memory_space<vmem>>, vector<1x16x16x64xf32>
    tpu.vector_store %arg6[%c0_12, %c0_13, %c0_14, %c0_15], %13 {strides = array<i32>} : memref<1x16x16x64xf32, #tpu.memory_space<vmem>>, vector<1x16x16x64xf32>,
    return
  }
  func.func @transform_0(%arg0: i32, %arg1: i32) -> (i32, i32, i32, i32) {
    %c0_i32 = arith.constant 0 : i32
    %c0_i32_0 = arith.constant 0 : i32
    %c0_i32_1 = arith.constant 0 : i32
    return %arg0, %arg1, %c0_i32, %c0_i32_0 : i32, i32, i32, i32
  }
  func.func @transform_1(%arg0: i32, %arg1: i32) -> (i32, i32) {
    %c0_i32 = arith.constant 0 : i32
    %c0_i32_0 = arith.constant 0 : i32
    %c0_i32_1 = arith.constant 0 : i32
    return %c0_i32, %c0_i32_0 : i32, i32
  }
  func.func @transform_2(%arg0: i32, %arg1: i32) -> (i32, i32) {
    %c0_i32 = arith.constant 0 : i32
    %c0_i32_0 = arith.constant 0 : i32
    %c0_i32_1 = arith.constant 0 : i32
    return %c0_i32, %c0_i32_0 : i32, i32
  }
  func.func @transform_3(%arg0: i32, %arg1: i32) -> (i32, i32, i32, i32) {
    %c0_i32 = arith.constant 0 : i32
    %c0_i32_0 = arith.constant 0 : i32
    %c0_i32_1 = arith.constant 0 : i32
    return %arg0, %arg1, %c0_i32, %c0_i32_0 : i32, i32, i32, i32
  }
  func.func @transform_4(%arg0: i32, %arg1: i32) -> (i32, i32, i32, i32) {
    %c0_i32 = arith.constant 0 : i32
    %c0_i32_0 = arith.constant 0 : i32
    %c0_i32_1 = arith.constant 0 : i32
    return %arg0, %arg1, %c0_i32, %c0_i32_0 : i32, i32, i32, i32
  }
}

</mosaic_0001>

<bundles_post_ra>
// kernel: tpu_custom_call.1
= control target key start
LH: loop header
LB: loop body
LE: loop exit
PB: predicated region body
PF: predicated region fallthrough
CT: control target
= control target key end

     0   :  { %s1503_s0 = inlined_call_operand.hbm [shape: f32[2,16,16,32], index: 0, kind: input, shape index: {}]   ;;  %s1504_s1 = inlined_call_operand.hbm [shape: bf16[32,64], index: 1, kind: input, shape index: {}]   ;;  %s1505_s2 = inlined_call_operand.vmem [shape: f32[1,64], index: 2, kind: input, shape index: {}]   ;;  %s1506_s3 = inlined_call_operand.hbm [shape: f32[2,16,16,64], index: 3, kind: output, shape index: {0}]   ;;  %s1507_s4 = inlined_call_operand.hbm [shape: f32[2,16,16,64], index: 4, kind: output, shape index: {1}]  }
   0x1   :  { %1509 = sst [smem:[#allocation15_spill]] %s1504_s1 }
   0x2   :  { %10 = vsyncpa [#allocation3], 0 }
   0x3   :  { %12 = vsyncpa [#allocation3 + $0x1], 0 }
   0x4   :  { %13 = vsyncpa [#allocation6], 0 }
   0x5   :  { %14 = vsyncpa [#allocation4], 0 }
   0x6   :  { %16 = vsyncpa [#allocation4 + $0x1], 0 }
   0x7   :  { %17 = vsyncpa [#allocation9], 0 }
   0x8   :  { %19 = vsyncpa [#allocation9 + $0x1], 0  ;;  %s1104_s15 = smov 0   ;;  %s1106_s16 = smov 0  }
   0x9   :  { %s1108_s17 = smov 0   ;;  %s1110_s18 = smov 0  }
   0xa   :  { %s1112_s19 = smov 0   ;;  %s1114_s20 = smov 0  }
   0xb LB: > { %s751_s21 = sadd.s32 4294967295, %s1070_s20   ;;  %s752_s22 = sadd.s32 4294967294, %s1070_s20   ;;  %s1070_s20 = sphi %s1114_s20, %s25_s20   ;;  %s1066_s19 = sphi %s1112_s19, %s1524_s19   ;;  %s1062_s18 = sphi %s1110_s18, %s1523_s18   ;;  %s1058_s17 = sphi %s1108_s17, %s1522_s17   ;;  %s1054_s16 = sphi %s1106_s16, %s1521_s16   ;;  %s1050_s15 = sphi %s1104_s15, %s1520_s15  }
   0xc   : > { %p59_p0 = scmp.ne.s32.totalorder %s1054_s16, %s1050_s15  ;;  %p1138_p1 = scmp.eq.s32.totalorder %s751_s21, 0 }
   0xd   : > { %p1142_p2 = scmp.eq.s32.totalorder %s751_s21, 1  ;;  %p133_p3 = scmp.eq.s32.totalorder %s752_s22, 1 }
   0xe   : > { %p1148_p4 = por %p1138_p1, %p59_p0  ;;  %p753_p5 = scmp.ge.s32.totalorder %s1070_s20, 1 }
   0xf   : > { %p1153_p6 = por %p133_p3, %p59_p0  ;;  %p168_p7 = scmp.lt.s32.totalorder %s1070_s20, 3 }
  0x10   : > { %s1514_s1 = sld [smem:[#allocation15_spill]]  ;;  %s1072_s5 = smov [#allocation5]  }
  0x11   : > { %p1161_p8 = pnand %p753_p5, %p168_p7  ;;  %s181_s6 = sshll.u32 %s1072_s5, 4  ;;  %s182_s6 = int_to_ptr.vmem [resolvable:$true] %s181_s6 }
  0x12   : > { %p755_p11 = scmp.ge.s32.totalorder %s1070_s20, 2  ;;  %s1073_s7 = smov 64  }
  0x13   : > { %p817_p9 = pneg %p1161_p8  ;;  %s1074_s8 = smov 4  }
  0x14   : > { %s37_s9 = sadd.s32 1, %s1066_s19  ;;  %s46_s10 = sadd.s32 1, %s1058_s17 }
  0x15   : > { %p818_p10 = pnand %p817_p9, %p1138_p1  ;;  %p39_p12 = scmp.ge.s32.totalorder %s37_s9, 2 }
  0x16   : > { %s179_s29 = sshll.u32 %s1514_s1, 4  ;;  %p53_p13 = scmp.ne.s32.totalorder %s1058_s17, %s1054_s16  ;;  %s180_s29 = int_to_ptr.hbm [resolvable:$true] %s179_s29 }
  0x17   : > { %820 = dma.hbm_to_vmem [thread:$0]  (!%p818_p10), %s180_s29, 256, %s182_s6, [#allocation6], %s1073_s7, %s1073_s7, %s1074_s8  }
  0x18   : > { %p54_p0 = scmp.eq.s32.totalorder %s1070_s20, 0  ;;  %s1526_s9 = smov (%p39_p12, %s37_s9), 0 }
  0x19   : > { %1516 = sst [smem:[#allocation14_spill]] %s1526_s9  ;;  %p1183_p5 = por %p1142_p2, %p53_p13 }
  0x1a   : > { %p1177_p3 = por %p54_p0, %p53_p13  ;;  %s41_s13 = ssub.s32 %s1066_s19, %s1526_s9 }
  0x1b   : > { %p833_p7 = scmp.lt.s32.totalorder %s1070_s20, 2  ;;  %p44_p9 = scmp.eq.s32.totalorder %s41_s13, 0 }
  0x1c   : > { %s198_s14 = sand.u32 1, %s1058_s17   ;;  %s796_s27 = sshll.u32 %s1066_s19, 8 }
  0x1d   : > { %s756_s21 = sshll.u32 %s198_s14, 8  ;;  %s210_s5 = scalar_lea.hbm %s1503_s0, %s796_s27 }
  0x1e   : > { %s1192_s22 = scalar_select %p44_p9, %s1058_s17, %s46_s10  }
  0x1f   : > { %s202_s6 = scalar_lea.vmem [#allocation2], %s756_s21  ;;  %s211_s24 = sshll.u32 %s210_s5, 4  ;;  %s212_s24 = int_to_ptr.hbm [resolvable:$true] %s211_s24 }
  0x20   : > { %s213_s7 = sshll.u32 %s202_s6, 4  ;;  %p822_p2 = pnand %p833_p7, %p1177_p3  ;;  %s214_s7 = int_to_ptr.vmem [resolvable:$true] %s213_s7 }
  0x21   : > { %s199_s8 = scalar_lea.sflag [#allocation3], %s198_s14  ;;  %s1075_s1 = smov 128  }
  0x22   : > { %s1076_s9 = smov 8   ;;  %225 = sbr.rel (%p1161_p8) target bundleno = 264 (0x108), region = 32 }
  0x23   : > { %824 = dma.hbm_to_vmem [thread:$0]  (!%p822_p2), %s212_s24, 4096, %s214_s7, %s199_s8, %s1075_s1, %s1075_s1, %s1076_s9  }
  0x24   : > { %s1203_s10 = sand.u32 (!%p1161_p8), 1, %s1054_s16  }
  0x25   : > { %s1206_s13 = sshll.u32 (!%p1161_p8), %s1203_s10, 8  ;;  %s228_s21 = scalar_lea.sflag (!%p1161_p8), [#allocation3], %s1203_s10 }
  0x26   : > { %s1210_s27 = scalar_lea.vmem (!%p1161_p8), [#allocation2], %s1206_s13 }
  0x27   : > { %1033 = dma.done.wait (%p1148_p4), %s228_s21, 4096  }
  0x28   : > { %1035 = vsyncadd (%p1148_p4), %s228_s21, 4294963200 }
  0x29   : > { %1037 = dma.done.wait (%p1138_p1), [#allocation6], 256  }
  0x2a   : > { %1039 = vsyncadd (%p1138_p1), [#allocation6], 4294967040  ;;  %v798_v0 = vld [vmem:[#allocation5 + $0x8] sm:$0xff]  ;;  %v797_v1 = vld [vmem:[#allocation5] sm:$0xff]  ;;  %vm339_vm0 = vcmask 261120   ;;  %vm477_vm1 = vcmask 523264  }
  0x2b   : > { %v271_v2 = vld [vmem:[%s1210_s27] sm:$0xff]  ;;  %v272_v3 = vld [vmem:[%s1210_s27 + $0x8] sm:$0xff]  ;;  %394 = vmatpush.bf16.msra.mxu0 %v798_v0  ;;  %801 = vmatpush.bf16.msra.mxu1 %v798_v0  ;;  %v273_v14 = vld [vmem:[%s1210_s27 + $0x10] sm:$0xff]  ;;  %s1276_s25 = scalar_lea.vmem [#allocation7], %s1206_s13  ;;  %s1283_s30 = scalar_lea.vmem [#allocation8], %s1206_s13 }
  0x2c   : > { %v279_v4 = vld [vmem:[%s1210_s27 + $0x40] sm:$0xff]  ;;  %v280_v5 = vld [vmem:[%s1210_s27 + $0x48] sm:$0xff]  ;;  %802 = vmatpush.bf16.msra.mxu2 %v798_v0  ;;  %803 = vmatpush.bf16.msra.mxu3 %v798_v0  ;;  %v303_v10 = vpack.c.bf16 %v272_v3, %v271_v2  ;;  %v274_v15 = vld [vmem:[%s1210_s27 + $0x18] sm:$0xff]  ;;  %s799_s9 = sshll.u32 %s1062_s18, 8  ;;  %s595_s18 = sshll.u32 %s1276_s25, 4  ;;  %s1437_s18 = int_to_ptr.vmem [resolvable:$true] %s595_s18 }
  0x2d   : > { %v287_v6 = vld [vmem:[%s1210_s27 + $0x80] sm:$0xff]  ;;  %v288_v7 = vld [vmem:[%s1210_s27 + $0x88] sm:$0xff]  ;;  %v307_v11 = vpack.c.bf16 %v280_v5, %v279_v4  ;;  %v281_v16 = vld [vmem:[%s1210_s27 + $0x50] sm:$0xff]  ;;  %v304_v22 = vpack.c.bf16 %v274_v15, %v273_v14  ;;  %s594_s28 = scalar_lea.hbm %s1506_s3, %s799_s9  ;;  %s614_s6 = scalar_lea.hbm %s1507_s4, %s799_s9 }
  0x2e   : > { %v295_v8 = vld [vmem:[%s1210_s27 + $0xc0] sm:$0xff]  ;;  %v296_v9 = vld [vmem:[%s1210_s27 + $0xc8] sm:$0xff]  ;;  %v311_v12 = vpack.c.bf16 %v288_v7, %v287_v6  ;;  %v282_v17 = vld [vmem:[%s1210_s27 + $0x58] sm:$0xff]  ;;  %s597_s7 = sshll.u32 %s594_s28, 4  ;;  %s615_s24 = sshll.u32 %s1283_s30, 4  ;;  %s598_s7 = int_to_ptr.hbm [resolvable:$true] %s597_s7  ;;  %s1448_s24 = int_to_ptr.vmem [resolvable:$true] %s615_s24 }
  0x2f   : > { %395 = vmatpush.bf16.msra.mxu0 %v797_v1  ;;  %804 = vmatpush.bf16.msra.mxu1 %v797_v1  ;;  %v315_v13 = vpack.c.bf16 %v296_v9, %v295_v8  ;;  %v289_v18 = vld [vmem:[%s1210_s27 + $0x90] sm:$0xff]  ;;  %v290_v19 = vld [vmem:[%s1210_s27 + $0x98] sm:$0xff]  ;;  %v308_v23 = vpack.c.bf16 %v282_v17, %v281_v16  ;;  %v275_v26 = vld [vmem:[%s1210_s27 + $0x20] sm:$0xff]  ;;  %s617_s8 = sshll.u32 %s614_s6, 4  ;;  %s575_s13 = scalar_lea.sflag [#allocation4], %s1203_s10  ;;  %s1450_s8 = int_to_ptr.hbm [resolvable:$true] %s617_s8 }
  0x30   : > { %805 = vmatpush.bf16.msra.mxu2 %v797_v1  ;;  %806 = vmatpush.bf16.msra.mxu3 %v797_v1  ;;  %v297_v20 = vld [vmem:[%s1210_s27 + $0xd0] sm:$0xff]  ;;  %v298_v21 = vld [vmem:[%s1210_s27 + $0xd8] sm:$0xff]  ;;  %v312_v24 = vpack.c.bf16 %v290_v19, %v289_v18  ;;  %v276_v27 = vld [vmem:[%s1210_s27 + $0x28] sm:$0xff]  ;;  %s966_s21 = sshra.s32 %s598_s7, 4  ;;  %s967_s21 = int_to_ptr.hbm [resolvable:$true] %s966_s21 }
  0x31   : > { %v316_v25 = vpack.c.bf16 %v298_v21, %v297_v20  ;;  %v283_v28 = vld [vmem:[%s1210_s27 + $0x60] sm:$0xff]  ;;  %v284_v29 = vld [vmem:[%s1210_s27 + $0x68] sm:$0xff]  ;;  %v305_v34 = vpack.c.bf16 %v276_v27, %v275_v26  ;;  %v277_v38 = vld [vmem:[%s1210_s27 + $0x30] sm:$0xff]  ;;  %p973_p10 = scmp.lt.s32.totalorder %s967_s21, %s1506_s3 }
  0x32   : > { %772 = vmatmul.msk.bf16.vlgmr.msra.gmra.mxu0 %vm339_vm0, %v303_v10  ;;  %776 = vmatmul.msk.bf16.vlgmr.msra.gmra.mxu1 %vm339_vm0, %v307_v11  ;;  %v291_v30 = vld [vmem:[%s1210_s27 + $0xa0] sm:$0xff]  ;;  %v292_v31 = vld [vmem:[%s1210_s27 + $0xa8] sm:$0xff]  ;;  %v309_v35 = vpack.c.bf16 %v284_v29, %v283_v28  ;;  %v278_v39 = vld [vmem:[%s1210_s27 + $0x38] sm:$0xff] }
  0x33   : > { %780 = vmatmul.msk.bf16.vlgmr.msra.gmra.mxu2 %vm339_vm0, %v311_v12  ;;  %784 = vmatmul.msk.bf16.vlgmr.msra.gmra.mxu3 %vm339_vm0, %v315_v13  ;;  %v299_v32 = vld [vmem:[%s1210_s27 + $0xe0] sm:$0xff]  ;;  %v300_v33 = vld [vmem:[%s1210_s27 + $0xe8] sm:$0xff]  ;;  %v313_v36 = vpack.c.bf16 %v292_v31, %v291_v30  ;;  %v285_v40 = vld [vmem:[%s1210_s27 + $0x70] sm:$0xff]  ;;  %v306_v46 = vpack.c.bf16 %v278_v39, %v277_v38 }
  0x34   : > { %v317_v37 = vpack.c.bf16 %v300_v33, %v299_v32  ;;  %v286_v41 = vld [vmem:[%s1210_s27 + $0x78] sm:$0xff]  ;;  %v293_v42 = vld [vmem:[%s1210_s27 + $0xb0] sm:$0xff]  ;;  %v1271_v50 = vld [vmem:[%s1505_s2] ss:$0 sm:$0xff] }
  0x35   : > { %v294_v43 = vld [vmem:[%s1210_s27 + $0xb8] sm:$0xff]  ;;  %v301_v44 = vld [vmem:[%s1210_s27 + $0xf0] sm:$0xff]  ;;  %v310_v47 = vpack.c.bf16 %v286_v41, %v285_v40 }
  0x36   : > { %v302_v45 = vld [vmem:[%s1210_s27 + $0xf8] sm:$0xff]  ;;  %v314_v48 = vpack.c.bf16 %v294_v43, %v293_v42  ;;  %s968_s27 = scalar_lea.hbm %s967_s21, 256 }
  0x37   : > { %v318_v49 = vpack.c.bf16 %v302_v45, %v301_v44  ;;  %p969_p1 = scmp.ne.s32.totalorder %s967_s21, %s968_s27 }
  0x39   : > { %p970_p4 = pnand %p969_p1, %p1183_p5 }
  0x3b   : > { %p971_p8 = pneg %p970_p4 }
  0x42   : > { %773 = vmatmul.msk.bf16.gmra.mxu0 %vm339_vm0, %v304_v22  ;;  %777 = vmatmul.msk.bf16.gmra.mxu1 %vm339_vm0, %v308_v23 }
  0x43   : > { %781 = vmatmul.msk.bf16.gmra.mxu2 %vm339_vm0, %v312_v24  ;;  %785 = vmatmul.msk.bf16.gmra.mxu3 %vm339_vm0, %v316_v25 }
  0x52   : > { %774 = vmatmul.msk.bf16.gmra.mxu0 %vm339_vm0, %v305_v34  ;;  %778 = vmatmul.msk.bf16.gmra.mxu1 %vm339_vm0, %v309_v35 }
  0x53   : > { %782 = vmatmul.msk.bf16.gmra.mxu2 %vm339_vm0, %v313_v36  ;;  %786 = vmatmul.msk.bf16.gmra.mxu3 %vm339_vm0, %v317_v37 }
  0x62   : > { %775 = vmatmul.msk.bf16.gmra.mxu0 %vm339_vm0, %v306_v46  ;;  %779 = vmatmul.msk.bf16.gmra.mxu1 %vm339_vm0, %v310_v47 }
  0x63   : > { %783 = vmatmul.msk.bf16.gmra.mxu2 %vm339_vm0, %v314_v48  ;;  %787 = vmatmul.msk.bf16.gmra.mxu3 %vm339_vm0, %v318_v49 }
  0xaf   : > { %v397_v51 = vpop.f32.mrf.mxu0  ;;  %v417_v52 = vpop.f32.mrf.mxu1 }
  0xb0   : > { %v398_v53 = vadd.f32 %v1271_v50, %v397_v51  ;;  %v418_v54 = vadd.f32 %v1271_v50, %v417_v52 }
  0xb2   : > { %478 = vst.msk [vmem:[%s1276_s25] sm:$0xff] %vm477_vm1, %v398_v53  ;;  %v510_v55 = vmax.f32 %v398_v53, 0.0  ;;  %v518_v56 = vmax.f32 %v418_v54, 0.0 }
  0xb3   : > { %486 = vst.msk [vmem:[%s1276_s25 + $0x40] sm:$0xff] %vm477_vm1, %v418_v54 }
  0xb4   : > { %542 = vst.msk [vmem:[%s1283_s30] sm:$0xff] %vm477_vm1, %v510_v55 }
  0xb5   : > { %550 = vst.msk [vmem:[%s1283_s30 + $0x40] sm:$0xff] %vm477_vm1, %v518_v56 }
  0xb6   : > { %v437_v57 = vpop.f32.mrf.mxu2  ;;  %v457_v58 = vpop.f32.mrf.mxu3 }
  0xb7   : > { %v438_v59 = vadd.f32 %v1271_v50, %v437_v57  ;;  %v458_v60 = vadd.f32 %v1271_v50, %v457_v58  ;;  %v399_v61 = vpop.f32.mrf.mxu0  ;;  %v419_v62 = vpop.f32.mrf.mxu1 }
  0xb8   : > { %v400_v63 = vadd.f32 %v1271_v50, %v399_v61  ;;  %v420_v0 = vadd.f32 %v1271_v50, %v419_v62 }
  0xb9   : > { %494 = vst.msk [vmem:[%s1276_s25 + $0x80] sm:$0xff] %vm477_vm1, %v438_v59  ;;  %v526_v1 = vmax.f32 %v438_v59, 0.0  ;;  %v534_v2 = vmax.f32 %v458_v60, 0.0 }
  0xba   : > { %502 = vst.msk [vmem:[%s1276_s25 + $0xc0] sm:$0xff] %vm477_vm1, %v458_v60  ;;  %v511_v3 = vmax.f32 %v400_v63, 0.0  ;;  %v519_v4 = vmax.f32 %v420_v0, 0.0 }
  0xbb   : > { %558 = vst.msk [vmem:[%s1283_s30 + $0x80] sm:$0xff] %vm477_vm1, %v526_v1 }
  0xbc   : > { %566 = vst.msk [vmem:[%s1283_s30 + $0xc0] sm:$0xff] %vm477_vm1, %v534_v2 }
  0xbd   : > { %479 = vst.msk [vmem:[%s1276_s25 + $0x8] sm:$0xff] %vm477_vm1, %v400_v63 }
  0xbe   : > { %543 = vst.msk [vmem:[%s1283_s30 + $0x8] sm:$0xff] %vm477_vm1, %v511_v3  ;;  %v439_v5 = vpop.f32.mrf.mxu2  ;;  %v459_v6 = vpop.f32.mrf.mxu3 }
  0xbf   : > { %487 = vst.msk [vmem:[%s1276_s25 + $0x48] sm:$0xff] %vm477_vm1, %v420_v0  ;;  %v440_v7 = vadd.f32 %v1271_v50, %v439_v5  ;;  %v460_v8 = vadd.f32 %v1271_v50, %v459_v6  ;;  %v402_v9 = vpop.f32.mrf.mxu0  ;;  %v422_v10 = vpop.f32.mrf.mxu1 }
  0xc0   : > { %551 = vst.msk [vmem:[%s1283_s30 + $0x48] sm:$0xff] %vm477_vm1, %v519_v4  ;;  %v403_v11 = vadd.f32 %v1271_v50, %v402_v9  ;;  %v423_v12 = vadd.f32 %v1271_v50, %v422_v10 }
  0xc1   : > { %495 = vst.msk [vmem:[%s1276_s25 + $0x88] sm:$0xff] %vm477_vm1, %v440_v7  ;;  %v527_v13 = vmax.f32 %v440_v7, 0.0  ;;  %v535_v14 = vmax.f32 %v460_v8, 0.0 }
  0xc2   : > { %503 = vst.msk [vmem:[%s1276_s25 + $0xc8] sm:$0xff] %vm477_vm1, %v460_v8  ;;  %v512_v15 = vmax.f32 %v403_v11, 0.0  ;;  %v520_v16 = vmax.f32 %v423_v12, 0.0 }
  0xc3   : > { %559 = vst.msk [vmem:[%s1283_s30 + $0x88] sm:$0xff] %vm477_vm1, %v527_v13 }
  0xc4   : > { %567 = vst.msk [vmem:[%s1283_s30 + $0xc8] sm:$0xff] %vm477_vm1, %v535_v14 }
  0xc5   : > { %480 = vst.msk [vmem:[%s1276_s25 + $0x10] sm:$0xff] %vm477_vm1, %v403_v11 }
  0xc6   : > { %544 = vst.msk [vmem:[%s1283_s30 + $0x10] sm:$0xff] %vm477_vm1, %v512_v15  ;;  %v442_v17 = vpop.f32.mrf.mxu2  ;;  %v462_v18 = vpop.f32.mrf.mxu3 }
  0xc7   : > { %488 = vst.msk [vmem:[%s1276_s25 + $0x50] sm:$0xff] %vm477_vm1, %v423_v12  ;;  %v443_v19 = vadd.f32 %v1271_v50, %v442_v17  ;;  %v463_v20 = vadd.f32 %v1271_v50, %v462_v18  ;;  %v404_v21 = vpop.f32.mrf.mxu0  ;;  %v424_v22 = vpop.f32.mrf.mxu1 }
  0xc8   : > { %552 = vst.msk [vmem:[%s1283_s30 + $0x50] sm:$0xff] %vm477_vm1, %v520_v16  ;;  %v405_v23 = vadd.f32 %v1271_v50, %v404_v21  ;;  %v425_v24 = vadd.f32 %v1271_v50, %v424_v22 }
  0xc9   : > { %496 = vst.msk [vmem:[%s1276_s25 + $0x90] sm:$0xff] %vm477_vm1, %v443_v19  ;;  %v528_v25 = vmax.f32 %v443_v19, 0.0  ;;  %v536_v26 = vmax.f32 %v463_v20, 0.0 }
  0xca   : > { %504 = vst.msk [vmem:[%s1276_s25 + $0xd0] sm:$0xff] %vm477_vm1, %v463_v20  ;;  %v513_v27 = vmax.f32 %v405_v23, 0.0  ;;  %v521_v28 = vmax.f32 %v425_v24, 0.0 }
  0xcb   : > { %560 = vst.msk [vmem:[%s1283_s30 + $0x90] sm:$0xff] %vm477_vm1, %v528_v25 }
  0xcc   : > { %568 = vst.msk [vmem:[%s1283_s30 + $0xd0] sm:$0xff] %vm477_vm1, %v536_v26 }
  0xcd   : > { %481 = vst.msk [vmem:[%s1276_s25 + $0x18] sm:$0xff] %vm477_vm1, %v405_v23 }
  0xce   : > { %545 = vst.msk [vmem:[%s1283_s30 + $0x18] sm:$0xff] %vm477_vm1, %v513_v27  ;;  %v444_v29 = vpop.f32.mrf.mxu2  ;;  %v464_v30 = vpop.f32.mrf.mxu3 }
  0xcf   : > { %489 = vst.msk [vmem:[%s1276_s25 + $0x58] sm:$0xff] %vm477_vm1, %v425_v24  ;;  %v445_v31 = vadd.f32 %v1271_v50, %v444_v29  ;;  %v465_v32 = vadd.f32 %v1271_v50, %v464_v30  ;;  %v407_v33 = vpop.f32.mrf.mxu0  ;;  %v427_v34 = vpop.f32.mrf.mxu1 }
  0xd0   : > { %553 = vst.msk [vmem:[%s1283_s30 + $0x58] sm:$0xff] %vm477_vm1, %v521_v28  ;;  %v408_v35 = vadd.f32 %v1271_v50, %v407_v33  ;;  %v428_v36 = vadd.f32 %v1271_v50, %v427_v34 }
  0xd1   : > { %497 = vst.msk [vmem:[%s1276_s25 + $0x98] sm:$0xff] %vm477_vm1, %v445_v31  ;;  %v529_v37 = vmax.f32 %v445_v31, 0.0  ;;  %v537_v38 = vmax.f32 %v465_v32, 0.0 }
  0xd2   : > { %505 = vst.msk [vmem:[%s1276_s25 + $0xd8] sm:$0xff] %vm477_vm1, %v465_v32  ;;  %v514_v39 = vmax.f32 %v408_v35, 0.0  ;;  %v522_v40 = vmax.f32 %v428_v36, 0.0 }
  0xd3   : > { %561 = vst.msk [vmem:[%s1283_s30 + $0x98] sm:$0xff] %vm477_vm1, %v529_v37 }
  0xd4   : > { %569 = vst.msk [vmem:[%s1283_s30 + $0xd8] sm:$0xff] %vm477_vm1, %v537_v38 }
  0xd5   : > { %482 = vst.msk [vmem:[%s1276_s25 + $0x20] sm:$0xff] %vm477_vm1, %v408_v35 }
  0xd6   : > { %546 = vst.msk [vmem:[%s1283_s30 + $0x20] sm:$0xff] %vm477_vm1, %v514_v39  ;;  %v447_v41 = vpop.f32.mrf.mxu2  ;;  %v467_v42 = vpop.f32.mrf.mxu3 }
  0xd7   : > { %490 = vst.msk [vmem:[%s1276_s25 + $0x60] sm:$0xff] %vm477_vm1, %v428_v36  ;;  %v448_v43 = vadd.f32 %v1271_v50, %v447_v41  ;;  %v468_v44 = vadd.f32 %v1271_v50, %v467_v42  ;;  %v409_v45 = vpop.f32.mrf.mxu0  ;;  %v429_v46 = vpop.f32.mrf.mxu1 }
  0xd8   : > { %554 = vst.msk [vmem:[%s1283_s30 + $0x60] sm:$0xff] %vm477_vm1, %v522_v40  ;;  %v410_v47 = vadd.f32 %v1271_v50, %v409_v45  ;;  %v430_v48 = vadd.f32 %v1271_v50, %v429_v46 }
  0xd9   : > { %498 = vst.msk [vmem:[%s1276_s25 + $0xa0] sm:$0xff] %vm477_vm1, %v448_v43  ;;  %v530_v49 = vmax.f32 %v448_v43, 0.0  ;;  %v538_v51 = vmax.f32 %v468_v44, 0.0 }
  0xda   : > { %506 = vst.msk [vmem:[%s1276_s25 + $0xe0] sm:$0xff] %vm477_vm1, %v468_v44  ;;  %v515_v52 = vmax.f32 %v410_v47, 0.0  ;;  %v523_v53 = vmax.f32 %v430_v48, 0.0 }
  0xdb   : > { %562 = vst.msk [vmem:[%s1283_s30 + $0xa0] sm:$0xff] %vm477_vm1, %v530_v49 }
  0xdc   : > { %570 = vst.msk [vmem:[%s1283_s30 + $0xe0] sm:$0xff] %vm477_vm1, %v538_v51 }
  0xdd   : > { %483 = vst.msk [vmem:[%s1276_s25 + $0x28] sm:$0xff] %vm477_vm1, %v410_v47 }
  0xde   : > { %547 = vst.msk [vmem:[%s1283_s30 + $0x28] sm:$0xff] %vm477_vm1, %v515_v52  ;;  %v449_v54 = vpop.f32.mrf.mxu2  ;;  %v469_v55 = vpop.f32.mrf.mxu3 }
  0xdf   : > { %491 = vst.msk [vmem:[%s1276_s25 + $0x68] sm:$0xff] %vm477_vm1, %v430_v48  ;;  %v450_v56 = vadd.f32 %v1271_v50, %v449_v54  ;;  %v470_v57 = vadd.f32 %v1271_v50, %v469_v55  ;;  %v412_v58 = vpop.f32.mrf.mxu0  ;;  %v432_v59 = vpop.f32.mrf.mxu1 }
  0xe0   : > { %555 = vst.msk [vmem:[%s1283_s30 + $0x68] sm:$0xff] %vm477_vm1, %v523_v53  ;;  %v413_v60 = vadd.f32 %v1271_v50, %v412_v58  ;;  %v433_v61 = vadd.f32 %v1271_v50, %v432_v59 }
  0xe1   : > { %499 = vst.msk [vmem:[%s1276_s25 + $0xa8] sm:$0xff] %vm477_vm1, %v450_v56  ;;  %v531_v62 = vmax.f32 %v450_v56, 0.0  ;;  %v539_v63 = vmax.f32 %v470_v57, 0.0 }
  0xe2   : > { %507 = vst.msk [vmem:[%s1276_s25 + $0xe8] sm:$0xff] %vm477_vm1, %v470_v57  ;;  %v516_v0 = vmax.f32 %v413_v60, 0.0  ;;  %v524_v1 = vmax.f32 %v433_v61, 0.0 }
  0xe3   : > { %563 = vst.msk [vmem:[%s1283_s30 + $0xa8] sm:$0xff] %vm477_vm1, %v531_v62 }
  0xe4   : > { %571 = vst.msk [vmem:[%s1283_s30 + $0xe8] sm:$0xff] %vm477_vm1, %v539_v63 }
  0xe5   : > { %484 = vst.msk [vmem:[%s1276_s25 + $0x30] sm:$0xff] %vm477_vm1, %v413_v60 }
  0xe6   : > { %548 = vst.msk [vmem:[%s1283_s30 + $0x30] sm:$0xff] %vm477_vm1, %v516_v0  ;;  %v452_v2 = vpop.f32.mrf.mxu2  ;;  %v472_v3 = vpop.f32.mrf.mxu3 }
  0xe7   : > { %492 = vst.msk [vmem:[%s1276_s25 + $0x70] sm:$0xff] %vm477_vm1, %v433_v61  ;;  %v453_v4 = vadd.f32 %v1271_v50, %v452_v2  ;;  %v473_v5 = vadd.f32 %v1271_v50, %v472_v3  ;;  %v414_v6 = vpop.f32.mrf.mxu0  ;;  %v434_v7 = vpop.f32.mrf.mxu1 }
  0xe8   : > { %556 = vst.msk [vmem:[%s1283_s30 + $0x70] sm:$0xff] %vm477_vm1, %v524_v1  ;;  %v415_v8 = vadd.f32 %v1271_v50, %v414_v6  ;;  %v435_v9 = vadd.f32 %v1271_v50, %v434_v7 }
  0xe9   : > { %500 = vst.msk [vmem:[%s1276_s25 + $0xb0] sm:$0xff] %vm477_vm1, %v453_v4  ;;  %v532_v10 = vmax.f32 %v453_v4, 0.0  ;;  %v540_v11 = vmax.f32 %v473_v5, 0.0 }
  0xea   : > { %508 = vst.msk [vmem:[%s1276_s25 + $0xf0] sm:$0xff] %vm477_vm1, %v473_v5  ;;  %v517_v12 = vmax.f32 %v415_v8, 0.0  ;;  %v525_v13 = vmax.f32 %v435_v9, 0.0 }
  0xeb   : > { %564 = vst.msk [vmem:[%s1283_s30 + $0xb0] sm:$0xff] %vm477_vm1, %v532_v10 }
  0xec   : > { %572 = vst.msk [vmem:[%s1283_s30 + $0xf0] sm:$0xff] %vm477_vm1, %v540_v11 }
  0xed   : > { %485 = vst.msk [vmem:[%s1276_s25 + $0x38] sm:$0xff] %vm477_vm1, %v415_v8 }
  0xee   : > { %549 = vst.msk [vmem:[%s1283_s30 + $0x38] sm:$0xff] %vm477_vm1, %v517_v12  ;;  %v454_v14 = vpop.f32.mrf.mxu2  ;;  %v474_v15 = vpop.f32.mrf.mxu3 }
  0xef   : > { %493 = vst.msk [vmem:[%s1276_s25 + $0x78] sm:$0xff] %vm477_vm1, %v435_v9  ;;  %v455_v16 = vadd.f32 %v1271_v50, %v454_v14  ;;  %v475_v17 = vadd.f32 %v1271_v50, %v474_v15 }
  0xf0   : > { %557 = vst.msk [vmem:[%s1283_s30 + $0x78] sm:$0xff] %vm477_vm1, %v525_v13 }
  0xf1   : > { %501 = vst.msk [vmem:[%s1276_s25 + $0xb8] sm:$0xff] %vm477_vm1, %v455_v16  ;;  %v533_v18 = vmax.f32 %v455_v16, 0.0  ;;  %v541_v19 = vmax.f32 %v475_v17, 0.0 }
  0xf2   : > { %509 = vst.msk [vmem:[%s1276_s25 + $0xf8] sm:$0xff] %vm477_vm1, %v475_v17  ;;  %s972_s25 = scalar_lea.hbm %s1506_s3, 512 }
  0xf3   : > { %565 = vst.msk [vmem:[%s1283_s30 + $0xb8] sm:$0xff] %vm477_vm1, %v533_v18  ;;  %p974_p12 = scmp.lt.s32.totalorder %s972_s25, %s968_s27 }
  0xf4   : > { %573 = vst.msk [vmem:[%s1283_s30 + $0xf8] sm:$0xff] %vm477_vm1, %v541_v19 }
  0xf5   : > { %p975_p13 = por %p974_p12, %p973_p10 }
  0xf7   : > { %p976_p0 = pnand %p975_p13, %p971_p8 }
  0xf9   : > { %979 = shalt.err (!%p976_p0)
}
  0xfa   : > { %s1077_s30 = smov 128   ;;  %s1078_s14 = smov 8  }
  0xfb   : > { %813 = dma.vmem_to_hbm [thread:$0]  (%p1183_p5), %s1437_s18, 4096, %s598_s7, %s575_s13, %s1077_s30, %s1077_s30, %s1078_s14  }
  0xfc   : > { %s580_s28 = scalar_lea.sflag [#allocation9], %s1203_s10  ;;  %s994_s29 = sshra.s32 %s1450_s8, 4  ;;  %s995_s29 = int_to_ptr.hbm [resolvable:$true] %s994_s29 }
  0xfd   : > { %s996_s5 = scalar_lea.hbm %s995_s29, 256  ;;  %s1000_s27 = scalar_lea.hbm %s1507_s4, 512 }
  0xfe   : > { %p997_p3 = scmp.ne.s32.totalorder %s995_s29, %s996_s5  ;;  %p1001_p2 = scmp.lt.s32.totalorder %s995_s29, %s1507_s4 }
  0xff   : > { %p1002_p1 = scmp.lt.s32.totalorder %s1000_s27, %s996_s5 }
 0x100   : > { %p998_p7 = pnand %p997_p3, %p1183_p5 }
 0x101   : > { %p1003_p4 = por %p1002_p1, %p1001_p2 }
 0x102   : > { %p999_p9 = pneg %p998_p7 }
 0x104   : > { %p1004_p8 = pnand %p1003_p4, %p999_p9 }
 0x106   : > { %1007 = shalt.err (!%p1004_p8)
}
 0x107   : > { %814 = dma.vmem_to_hbm [thread:$0]  (%p1183_p5), %s1448_s24, 4096, %s1450_s8, %s580_s28, %s1077_s30, %s1077_s30, %s1078_s14  }
 0x108 PF: > { %s632_s10 = sand.u32 1, %s1050_s15   ;;  %p826_p10 = pnand %p755_p11, %p1153_p6 }
 0x109   : > { %s633_s18 = scalar_lea.sflag [#allocation4], %s632_s10 }
 0x10a   : > { %p827_p12 = pneg %p826_p10 }
 0x10c   : > { %1041 = dma.done.wait (%p827_p12), %s633_s18, 4096  }
 0x10d   : > { %1043 = vsyncadd (%p827_p12), %s633_s18, 4294963200  ;;  %s643_s7 = scalar_lea.sflag [#allocation9], %s632_s10 }
 0x10e   : > { %1045 = dma.done.wait (%p827_p12), %s643_s7, 4096  }
 0x10f   : > { %1047 = vsyncadd (%p827_p12), %s643_s7, 4294963200  ;;  %s25_s20 = sadd.s32 1, %s1070_s20   ;;  %s1519_s12 = sld [smem:[#allocation14_spill]] }
 0x110   : > { %p22_p13 = scmp.ge.s32.totalorder %s25_s20, 4   ;;  %s1520_s15 = smov %s1054_s16 }
 0x111   : > { %s1521_s16 = smov %s1058_s17  ;;  %s1522_s17 = smov %s1192_s22 }
 0x112   : > { %s1523_s18 = smov %s1066_s19  ;;  %24 = sbr.rel (!%p22_p13) target bundleno = 11 (0xb), region = 98 }
 0x115   : > { %s1524_s19 = smov %s1519_s12 }
 0x117   :  { %649 = vsyncpa [#allocation3], 1 }
 0x118   :  { %651 = vsyncpa [#allocation3 + $0x1], 1 }
 0x119   :  { %652 = vsyncpa [#allocation6], 1 }
 0x11a   :  { %653 = vsyncpa [#allocation4], 1 }
 0x11b   :  { %655 = vsyncpa [#allocation4 + $0x1], 1 }
 0x11c   :  { %656 = vsyncpa [#allocation9], 1 }
 0x11d   :  { %658 = vsyncpa [#allocation9 + $0x1], 1 }

</bundles_post_ra>
